<compile_context>
chip_gen: v7x
topology: tpu7x:2x2x1
jax: 0.10.0
libtpu: 0.0.40
codegen_flags: <defaults>
</compile_context>

<pallas_src>
import functools

import jax
import jax.numpy as jnp
from jax.experimental import pallas as pl
from jax.experimental.pallas import tpu as pltpu


_VMEM_LIMIT = 48 * 1024 * 1024  # explicit: v5e scoped default is 16 MiB; v7x physical is 64 MiB


def _round_up(v, m):
    return (v + m - 1) // m * m


def _pick_tile(size, cap, align):
    """Largest align-multiple tile <= min(cap, floor(size, align)); full dim if size <= align."""
    if size <= align:
        return size
    return max(align, min(cap, (size // align) * align))


def _row_align(dtype):
    # Sub-32-bit dtypes pack along sublanes: bf16 -> 16 rows per vreg, int8/fp8 -> 32.
    itemsize = jnp.dtype(dtype).itemsize
    return max(8, 32 // max(itemsize, 1))


def _pick_tiles(nc, hw, dtype, row_cap, hw_cap_max, elem_budget):
    align = _row_align(dtype)
    tile_r = _pick_tile(nc, row_cap, align)
    # Guarantee >= 2 row tiles when possible so a v7x chip's two TensorCores
    # both get work on the "parallel" row axis.
    if nc > align and pl.cdiv(nc, tile_r) < 2:
        tile_r = max(align, _round_up(-(-nc // 2), align))
    hw_cap = max(128, min(hw_cap_max, (elem_budget // tile_r) // 128 * 128))
    tile_hw = _pick_tile(hw, hw_cap, 128)
    return tile_r, tile_hw


def _stats_kernel(x_ref, stat_ref, acc_s_ref, acc_q_ref, *, hw, tile_hw, sw, need_mask):
    # x_ref: (tile_r, tile_hw) input dtype.  stat_ref: (tile_r, 2) f32, resident
    # across the hw (reduction) axis.  acc_*: (tile_r, sw) f32 VMEM scratch.
    k = pl.program_id(1)

    @pl.when(k == 0)
    def _():
        acc_s_ref[...] = jnp.zeros_like(acc_s_ref)
        acc_q_ref[...] = jnp.zeros_like(acc_q_ref)

    x = x_ref[...].astype(jnp.float32)
    if need_mask:
        # Last hw tile is ragged: zero out-of-range lanes before accumulating.
        col = jax.lax.broadcasted_iota(jnp.int32, x.shape, 1) + k * tile_hw
        x = jnp.where(col < hw, x, 0.0)
    xx = x * x

    # Fold lane groups with VALU adds (static 128-wide slices are free vreg
    # selections); the cross-lane XLU reduce happens only once per row tile.
    n_groups = tile_hw // sw
    ps = x[:, 0:sw]
    pq = xx[:, 0:sw]
    for g in range(1, n_groups):
        ps = ps + x[:, g * sw:(g + 1) * sw]
        pq = pq + xx[:, g * sw:(g + 1) * sw]
    acc_s_ref[...] += ps
    acc_q_ref[...] += pq

    @pl.when(k == pl.num_programs(1) - 1)
    def _():
        s = jnp.sum(acc_s_ref[...], axis=1, keepdims=True)
        q = jnp.sum(acc_q_ref[...], axis=1, keepdims=True)
        stat_ref[...] = jnp.concatenate([s, q], axis=1)


def _normalize_kernel(ac_ref, x_ref, o_ref):
    # Normalization + affine folded into per-row scale/shift: o = x * a + c.
    x = x_ref[...].astype(jnp.float32)
    a = ac_ref[:, 0:1]
    c = ac_ref[:, 1:2]
    o_ref[...] = (x * a + c).astype(o_ref.dtype)


@functools.partial(jax.jit, static_argnames=("eps",))
def switch_norm_2d(x, weight, bias, mean_weight, var_weight, eps=1e-5):
    """SwitchNorm2d forward (training mode, using_bn=True).

    x: (N, C, H, W). weight/bias: (1, C, 1, 1). mean_weight/var_weight: (3,).
    Output dtype matches x.dtype; statistics are computed in float32.
    """
    N, C, H, W = x.shape
    NC = N * C
    HW = H * W
    x2 = x.reshape(NC, HW)  # metadata-only reshape; no pad, no copy

    # ---- Phase 1: per-(n, c) sum(x) and sum(x*x) over spatial ----------------
    # hw cap 4096 keeps the in-kernel lane-group unroll <= 32 while amortizing
    # per-step overhead.
    tile_r1, tile_hw1 = _pick_tiles(NC, HW, x.dtype, row_cap=256,
                                    hw_cap_max=4096, elem_budget=1 << 20)
    sw = 128 if tile_hw1 % 128 == 0 else tile_hw1
    need_mask = (HW % tile_hw1) != 0
    grid1 = (pl.cdiv(NC, tile_r1), pl.cdiv(HW, tile_hw1))

    stats = pl.pallas_call(
        functools.partial(_stats_kernel, hw=HW, tile_hw=tile_hw1, sw=sw,
                          need_mask=need_mask),
        out_shape=jax.ShapeDtypeStruct((NC, 2), jnp.float32),
        grid=grid1,
        in_specs=[pl.BlockSpec((tile_r1, tile_hw1), lambda i, k: (i, k))],
        out_specs=pl.BlockSpec((tile_r1, 2), lambda i, k: (i, 0)),
        scratch_shapes=[pltpu.VMEM((tile_r1, sw), jnp.float32),
                        pltpu.VMEM((tile_r1, sw), jnp.float32)],
        compiler_params=pltpu.CompilerParams(
            dimension_semantics=("parallel", "arbitrary"),
            vmem_limit_bytes=_VMEM_LIMIT),
    )(x2)

    # ---- IN / LN / BN mixing on tiny (N, C) arrays (fused inside this jit) ---
    sum_x = stats[:, 0].reshape(N, C)
    sum_sq = stats[:, 1].reshape(N, C)

    hw_f = jnp.float32(HW)
    mean_in = sum_x / hw_f
    # torch.Tensor.var defaults to unbiased (divide by HW - 1); guard HW == 1.
    # NOTE: single-pass E[x^2]-E[x]^2 can lose precision vs PyTorch's two-pass
    # var for large HW with a large mean; the clamp below guards sqrt(neg).
    var_in = (sum_sq - hw_f * mean_in * mean_in) / jnp.float32(max(HW - 1, 1))

    mean_ln = mean_in.mean(axis=1, keepdims=True)
    temp = var_in + mean_in * mean_in
    var_ln = temp.mean(axis=1, keepdims=True) - mean_ln * mean_ln

    mean_bn = mean_in.mean(axis=0, keepdims=True)
    var_bn = temp.mean(axis=0, keepdims=True) - mean_bn * mean_bn

    mw = jax.nn.softmax(mean_weight.astype(jnp.float32), axis=0)
    vw = jax.nn.softmax(var_weight.astype(jnp.float32), axis=0)

    mean = mw[0] * mean_in + mw[1] * mean_ln + mw[2] * mean_bn
    var = vw[0] * var_in + vw[1] * var_ln + vw[2] * var_bn
    var = jnp.maximum(var, 0.0)

    gamma = weight.reshape(C).astype(jnp.float32)
    beta = bias.reshape(C).astype(jnp.float32)
    inv = jax.lax.rsqrt(var + jnp.float32(eps))           # (N, C)
    a_sc = gamma[None, :] * inv                           # (N, C) scale
    c_sc = beta[None, :] - mean * a_sc                    # (N, C) shift
    ac = jnp.stack([a_sc, c_sc], axis=-1).reshape(NC, 2)  # fused per-row scale/shift

    # ---- Phase 2: normalize + affine, fully parallel elementwise pass --------
    tile_r2, tile_hw2 = _pick_tiles(NC, HW, x.dtype, row_cap=512,
                                    hw_cap_max=65536, elem_budget=1 << 20)
    grid2 = (pl.cdiv(NC, tile_r2), pl.cdiv(HW, tile_hw2))

    out2 = pl.pallas_call(
        _normalize_kernel,
        out_shape=jax.ShapeDtypeStruct((NC, HW), x.dtype),
        grid=grid2,
        in_specs=[pl.BlockSpec((tile_r2, 2), lambda i, j: (i, 0)),
                  pl.BlockSpec((tile_r2, tile_hw2), lambda i, j: (i, j))],
        out_specs=pl.BlockSpec((tile_r2, tile_hw2), lambda i, j: (i, j)),
        compiler_params=pltpu.CompilerParams(
            dimension_semantics=("parallel", "parallel"),
            vmem_limit_bytes=_VMEM_LIMIT),
    )(ac, x2)

    return out2.reshape(N, C, H, W)


def _reference_switch_norm_2d(x, weight, bias, mean_weight, var_weight, eps=1e-5):
    """Pure-JAX reference mirroring the PyTorch forward (training, using_bn)."""
    N, C, H, W = x.shape
    xr = x.reshape(N, C, -1).astype(jnp.float32)
    mean_in = xr.mean(-1, keepdims=True)
    var_in = xr.var(-1, ddof=1, keepdims=True)
    mean_ln = mean_in.mean(1, keepdims=True)
    temp = var_in + mean_in ** 2
    var_ln = temp.mean(1, keepdims=True) - mean_ln ** 2
    mean_bn = mean_in.mean(0, keepdims=True)
    var_bn = temp.mean(0, keepdims=True) - mean_bn ** 2
    mw = jax.nn.softmax(mean_weight.astype(jnp.float32), axis=0)
    vw = jax.nn.softmax(var_weight.astype(jnp.float32), axis=0)
    mean = mw[0] * mean_in + mw[1] * mean_ln + mw[2] * mean_bn
    var = vw[0] * var_in + vw[1] * var_ln + vw[2] * var_bn
    xn = (xr - mean) / jnp.sqrt(var + eps)
    xn = xn.reshape(N, C, H, W)
    return xn * weight.astype(jnp.float32) + bias.astype(jnp.float32)


if __name__ == "__main__":
    key = jax.random.PRNGKey(0)

    # Deterministic parameter init matching SwitchNorm2d.reset_parameters()
    # (last_gamma=False, using_bn=True).
    def make_params(C):
        weight = jnp.ones((1, C, 1, 1), dtype=jnp.float32)
        bias = jnp.zeros((1, C, 1, 1), dtype=jnp.float32)
        mean_weight = jnp.ones((3,), dtype=jnp.float32)
        var_weight = jnp.ones((3,), dtype=jnp.float32)
        return weight, bias, mean_weight, var_weight

    # 1) Aligned f32 case.
    N, C, H, W = 2, 4, 16, 16
    x = jax.random.normal(key, (N, C, H, W), dtype=jnp.float32)
    weight, bias, mean_weight, var_weight = make_params(C)
    out = jax.block_until_ready(switch_norm_2d(x, weight, bias, mean_weight, var_weight))
    ref = _reference_switch_norm_2d(x, weight, bias, mean_weight, var_weight)
    assert out.shape == (N, C, H, W) and out.dtype == x.dtype
    assert jnp.allclose(out, ref, atol=1e-4, rtol=1e-4), "mismatch vs reference (aligned)"

    # 2) Unaligned f32 case (HW < 128, NC not a multiple of 8).
    N2, C2, H2, W2 = 2, 3, 10, 10
    x2 = jax.random.normal(jax.random.PRNGKey(1), (N2, C2, H2, W2), dtype=jnp.float32)
    w2, b2, mw2, vw2 = make_params(C2)
    out2 = jax.block_until_ready(switch_norm_2d(x2, w2, b2, mw2, vw2))
    ref2 = _reference_switch_norm_2d(x2, w2, b2, mw2, vw2)
    assert out2.shape == (N2, C2, H2, W2)
    assert jnp.allclose(out2, ref2, atol=1e-4, rtol=1e-4), "mismatch vs reference (unaligned)"

    # 3) bf16 case with ragged row and hw tiles (exercises the in-kernel masks).
    N3, C3, H3, W3 = 3, 6, 17, 13
    x3 = jax.random.normal(jax.random.PRNGKey(2), (N3, C3, H3, W3), dtype=jnp.bfloat16)
    w3, b3, mw3, vw3 = make_params(C3)
    out3 = jax.block_until_ready(switch_norm_2d(x3, w3, b3, mw3, vw3))
    ref3 = _reference_switch_norm_2d(x3, w3, b3, mw3, vw3)
    assert out3.shape == (N3, C3, H3, W3) and out3.dtype == x3.dtype
    assert jnp.allclose(out3.astype(jnp.float32), ref3, atol=3e-2, rtol=3e-2), \
        "mismatch vs reference (bf16 ragged)"

    print("KERNEL_OK")
</pallas_src>

<mosaic_0001>
module attributes {stable_mosaic.version = 11 : i64} {
  func.func @_stats_kernel(%arg0: i32, %arg1: i32, %arg2: memref<8x256xf32, #tpu.memory_space<vmem>>, %arg3: memref<8x2xf32, #tpu.memory_space<vmem>>, %arg4: memref<8x128xf32, #tpu.memory_space<vmem>>, %arg5: memref<8x128xf32, #tpu.memory_space<vmem>>) attributes {dimension_semantics = [#tpu.dimension_semantics<parallel>, #tpu.dimension_semantics<arbitrary>], iteration_bounds = array<i64: 1, 1>, scalar_prefetch = 0 : i64, scratch_operands = 2 : i64, tpu.core_type = #tpu.core_type<tc>, window_params = [{transform_indices = @transform_0, window_bounds = array<i64: 8, 256>}, {transform_indices = @transform_1, window_bounds = array<i64: 8, 2>}]} {
    %c0_i32 = arith.constant 0 : i32
    %0 = arith.cmpi eq, %arg1, %c0_i32 : i32
    %1 = arith.extui %0 : i1 to i32
    %c0_i32_0 = arith.constant 0 : i32
    %2 = arith.cmpi ne, %1, %c0_i32_0 : i32
    scf.if %2 {
      %cst = arith.constant 0.000000e+00 : f32
      %20 = vector.broadcast %cst : f32 to vector<8x128xf32>
      %c0_12 = arith.constant 0 : index
      %c0_13 = arith.constant 0 : index
      %21 = vector.load %arg4[%c0_12, %c0_13] : memref<8x128xf32, #tpu.memory_space<vmem>>, vector<8x128xf32>
      tpu.vector_store %arg4[%c0_12, %c0_13], %20 {strides = array<i32>} : memref<8x128xf32, #tpu.memory_space<vmem>>, vector<8x128xf32>,
      %cst_14 = arith.constant 0.000000e+00 : f32
      %22 = vector.broadcast %cst_14 : f32 to vector<8x128xf32>
      %c0_15 = arith.constant 0 : index
      %c0_16 = arith.constant 0 : index
      %23 = vector.load %arg5[%c0_15, %c0_16] : memref<8x128xf32, #tpu.memory_space<vmem>>, vector<8x128xf32>
      tpu.vector_store %arg5[%c0_15, %c0_16], %22 {strides = array<i32>} : memref<8x128xf32, #tpu.memory_space<vmem>>, vector<8x128xf32>,
    } else {
    }
    %c0 = arith.constant 0 : index
    %c0_1 = arith.constant 0 : index
    %3 = vector.load %arg2[%c0, %c0_1] : memref<8x256xf32, #tpu.memory_space<vmem>>, vector<8x256xf32>
    %4 = arith.mulf %3, %3 : vector<8x256xf32>
    %5 = vector.extract_strided_slice %3 {offsets = [0, 0], sizes = [8, 128], strides = [1, 1]} : vector<8x256xf32> to vector<8x128xf32>
    %6 = vector.extract_strided_slice %4 {offsets = [0, 0], sizes = [8, 128], strides = [1, 1]} : vector<8x256xf32> to vector<8x128xf32>
    %7 = vector.extract_strided_slice %3 {offsets = [0, 128], sizes = [8, 128], strides = [1, 1]} : vector<8x256xf32> to vector<8x128xf32>
    %8 = arith.addf %5, %7 : vector<8x128xf32>
    %9 = vector.extract_strided_slice %4 {offsets = [0, 128], sizes = [8, 128], strides = [1, 1]} : vector<8x256xf32> to vector<8x128xf32>
    %10 = arith.addf %6, %9 : vector<8x128xf32>
    %c0_2 = arith.constant 0 : index
    %c0_3 = arith.constant 0 : index
    %11 = vector.load %arg4[%c0_2, %c0_3] : memref<8x128xf32, #tpu.memory_space<vmem>>, vector<8x128xf32>
    %12 = arith.addf %11, %8 : vector<8x128xf32>
    %c0_4 = arith.constant 0 : index
    %c0_5 = arith.constant 0 : index
    %13 = vector.load %arg4[%c0_4, %c0_5] : memref<8x128xf32, #tpu.memory_space<vmem>>, vector<8x128xf32>
    tpu.vector_store %arg4[%c0_4, %c0_5], %12 {strides = array<i32>} : memref<8x128xf32, #tpu.memory_space<vmem>>, vector<8x128xf32>,
    %c0_6 = arith.constant 0 : index
    %c0_7 = arith.constant 0 : index
    %14 = vector.load %arg5[%c0_6, %c0_7] : memref<8x128xf32, #tpu.memory_space<vmem>>, vector<8x128xf32>
    %15 = arith.addf %14, %10 : vector<8x128xf32>
    %c0_8 = arith.constant 0 : index
    %c0_9 = arith.constant 0 : index
    %16 = vector.load %arg5[%c0_8, %c0_9] : memref<8x128xf32, #tpu.memory_space<vmem>>, vector<8x128xf32>
    tpu.vector_store %arg5[%c0_8, %c0_9], %15 {strides = array<i32>} : memref<8x128xf32, #tpu.memory_space<vmem>>, vector<8x128xf32>,
    %c0_i32_10 = arith.constant 0 : i32
    %17 = arith.cmpi eq, %arg1, %c0_i32_10 : i32
    %18 = arith.extui %17 : i1 to i32
    %c0_i32_11 = arith.constant 0 : i32
    %19 = arith.cmpi ne, %18, %c0_i32_11 : i32
    scf.if %19 {
      %c0_12 = arith.constant 0 : index
      %c0_13 = arith.constant 0 : index
      %20 = vector.load %arg4[%c0_12, %c0_13] : memref<8x128xf32, #tpu.memory_space<vmem>>, vector<8x128xf32>
      %cst = arith.constant dense<0.000000e+00> : vector<8xf32>
      %21 = vector.multi_reduction <add>, %20, %cst [1] : vector<8x128xf32> to vector<8xf32>
      %22 = vector.shape_cast %21 : vector<8xf32> to vector<8x1xf32>
      %c0_14 = arith.constant 0 : index
      %c0_15 = arith.constant 0 : index
      %23 = vector.load %arg5[%c0_14, %c0_15] : memref<8x128xf32, #tpu.memory_space<vmem>>, vector<8x128xf32>
      %cst_16 = arith.constant dense<0.000000e+00> : vector<8xf32>
      %24 = vector.multi_reduction <add>, %23, %cst_16 [1] : vector<8x128xf32> to vector<8xf32>
      %25 = vector.shape_cast %24 : vector<8xf32> to vector<8x1xf32>
      %26 = tpu.concatenate %22, %25 in 1 : vector<8x1xf32>, vector<8x1xf32> -> vector<8x2xf32>
      %c0_17 = arith.constant 0 : index
      %c0_18 = arith.constant 0 : index
      %27 = vector.load %arg3[%c0_17, %c0_18] : memref<8x2xf32, #tpu.memory_space<vmem>>, vector<8x2xf32>
      tpu.vector_store %arg3[%c0_17, %c0_18], %26 {strides = array<i32>} : memref<8x2xf32, #tpu.memory_space<vmem>>, vector<8x2xf32>,
    } else {
    }
    return
  }
  func.func @transform_0(%arg0: i32, %arg1: i32) -> (i32, i32) {
    %c0_i32 = arith.constant 0 : i32
    return %arg0, %arg1 : i32, i32
  }
  func.func @transform_1(%arg0: i32, %arg1: i32) -> (i32, i32) {
    %c0_i32 = arith.constant 0 : i32
    %c0_i32_0 = arith.constant 0 : i32
    return %arg0, %c0_i32 : i32, i32
  }
}

module attributes {stable_mosaic.version = 11 : i64} {
  func.func @_normalize_kernel(%arg0: i32, %arg1: i32, %arg2: memref<8x2xf32, #tpu.memory_space<vmem>>, %arg3: memref<8x256xf32, #tpu.memory_space<vmem>>, %arg4: memref<8x256xf32, #tpu.memory_space<vmem>>) attributes {dimension_semantics = [#tpu.dimension_semantics<parallel>, #tpu.dimension_semantics<parallel>], iteration_bounds = array<i64: 1, 1>, scalar_prefetch = 0 : i64, scratch_operands = 0 : i64, tpu.core_type = #tpu.core_type<tc>, window_params = [{transform_indices = @transform_0, window_bounds = array<i64: 8, 2>}, {transform_indices = @transform_1, window_bounds = array<i64: 8, 256>}, {transform_indices = @transform_2, window_bounds = array<i64: 8, 256>}]} {
    %c0 = arith.constant 0 : index
    %c0_0 = arith.constant 0 : index
    %0 = vector.load %arg3[%c0, %c0_0] : memref<8x256xf32, #tpu.memory_space<vmem>>, vector<8x256xf32>
    %c0_1 = arith.constant 0 : index
    %c0_2 = arith.constant 0 : index
    %1 = vector.load %arg2[%c0_1, %c0_2] : memref<8x2xf32, #tpu.memory_space<vmem>>, vector<8x1xf32>
    %c0_3 = arith.constant 0 : index
    %c1 = arith.constant 1 : index
    %2 = vector.load %arg2[%c0_3, %c1] : memref<8x2xf32, #tpu.memory_space<vmem>>, vector<8x1xf32>
    %3 = vector.broadcast %1 : vector<8x1xf32> to vector<8x256xf32>
    %4 = arith.mulf %0, %3 : vector<8x256xf32>
    %5 = vector.broadcast %2 : vector<8x1xf32> to vector<8x256xf32>
    %6 = arith.addf %4, %5 : vector<8x256xf32>
    %c0_4 = arith.constant 0 : index
    %c0_5 = arith.constant 0 : index
    %7 = vector.load %arg4[%c0_4, %c0_5] : memref<8x256xf32, #tpu.memory_space<vmem>>, vector<8x256xf32>
    tpu.vector_store %arg4[%c0_4, %c0_5], %6 {strides = array<i32>} : memref<8x256xf32, #tpu.memory_space<vmem>>, vector<8x256xf32>,
    return
  }
  func.func @transform_0(%arg0: i32, %arg1: i32) -> (i32, i32) {
    %c0_i32 = arith.constant 0 : i32
    %c0_i32_0 = arith.constant 0 : i32
    return %arg0, %c0_i32 : i32, i32
  }
  func.func @transform_1(%arg0: i32, %arg1: i32) -> (i32, i32) {
    %c0_i32 = arith.constant 0 : i32
    return %arg0, %arg1 : i32, i32
  }
  func.func @transform_2(%arg0: i32, %arg1: i32) -> (i32, i32) {
    %c0_i32 = arith.constant 0 : i32
    return %arg0, %arg1 : i32, i32
  }
}

</mosaic_0001>

<bundles_post_ra>
// kernel: squeeze.9
= control target key start
LH: loop header
LB: loop body
LE: loop exit
PB: predicated region body
PF: predicated region fallthrough
CT: control target
= control target key end

     0   :  { %vm7_vm0 = vcmask 31744   ;;  %s39_s0 = inlined_call_operand.vmem [shape: f32[8], index: 0, kind: input, shape index: {}]   ;;  %s40_s1 = inlined_call_operand.vmem [shape: f32[2,4], index: 1, kind: output, shape index: {}]  }
   0x1   :  { %v4_v0 = vld [vmem:[%s39_s0] sm:$0x1]  ;;  %s22_s0 = smov 124  }
   0x2   :  { %5 = vst [vmem:[#allocation1] sm:$0x1] %v4_v0 }
   0x9   :  { %v9_v1 = vld [vmem:[#allocation1] sm:$0x1]  }
   0xa   :  { %v6_v2 = vld [vmem:[#allocation1] sm:$0x1]   ;;  %10 = vrot.lane.b32.xlu0 %v9_v1, %s22_s0 }
   0xb   :  { %8 = vst.msk [vmem:[#allocation0] sm:$0x1] %vm7_vm0, %v6_v2  }
  0x7c   :  { %v11_v3 = vpop.permute.xlu0 %10  }
  0x7d   :  { %14 = vst.msk [vmem:[#allocation0 + $0x1] sm:$0x1] %vm7_vm0, %v11_v3  }
  0x84   :  { %v18_v4 = vld [vmem:[#allocation0] sm:$0x3] }
  0x85   :  { %20 = vst [vmem:[%s40_s1] sm:$0x3] %v18_v4 }

// kernel: switch_norm_2d.3
= control target key start
LH: loop header
LB: loop body
LE: loop exit
PB: predicated region body
PF: predicated region fallthrough
CT: control target
= control target key end

     0   :  { %v37_v0 = vmov 0   ;;  %v38_v2 = vmov 1   ;;  %s69_s0 = inlined_call_operand.vmem [shape: f32[8,2], index: 0, kind: input, shape index: {}]   ;;  %s70_s1 = inlined_call_operand.vmem [shape: f32[8,256], index: 1, kind: input, shape index: {}]   ;;  %s71_s2 = inlined_call_operand.vmem [shape: f32[8,256], index: 2, kind: output, shape index: {}]  }
   0x1   :  { %35 = vset.pattern.permute.xlu0 %v37_v0  ;;  %v13_v1 = vld [vmem:[%s69_s0] sm:$0xff]  ;;  %v12_v5 = vld [vmem:[%s70_s1 + $0x8] sm:$0xff] }
   0x2   :  { %16 = vperm.xlu0 %35, %v13_v1   ;;  %v11_v4 = vld [vmem:[%s70_s1] sm:$0xff] }
   0x6   :  { %36 = vset.pattern.permute.xlu0 %v38_v2 }
   0x7   :  { %22 = vperm.xlu0 %36, %v13_v1  }
  0x81   :  { %v17_v3 = vpop.permute.xlu0 %16 }
  0x82   :  { %v19_v6 = vmul.f32 %v17_v3, %v11_v4  ;;  %v20_v7 = vmul.f32 %v17_v3, %v12_v5 }
  0x86   :  { %v23_v8 = vpop.permute.xlu0 %22 }
  0x87   :  { %v25_v9 = vadd.f32 %v23_v8, %v19_v6  ;;  %v26_v10 = vadd.f32 %v23_v8, %v20_v7 }
  0x89   :  { %27 = vst [vmem:[%s71_s2] sm:$0xff] %v25_v9  ;;  %28 = vst [vmem:[%s71_s2 + $0x8] sm:$0xff] %v26_v10 }

// kernel: switch_norm_2d.2
= control target key start
LH: loop header
LB: loop body
LE: loop exit
PB: predicated region body
PF: predicated region fallthrough
CT: control target
= control target key end

     0   :  { %vm35_vm0 = vcmask 7168   ;;  %vm37_vm1 = vcmask 15360   ;;  %s62_s0 = inlined_call_operand.vmem [shape: f32[8,256], index: 0, kind: input, shape index: {}]   ;;  %s63_s1 = inlined_call_operand.vmem [shape: f32[8,2], index: 1, kind: output, shape index: {}]  }
   0x1   :  { %v14_v0 = vld [vmem:[%s62_s0] sm:$0xff]  ;;  %v15_v1 = vld [vmem:[%s62_s0 + $0x8] sm:$0xff] }
   0x2   :  { %v17_v2 = vmul.f32 %v15_v1, %v15_v1  ;;  %v18_v3 = vadd.f32 %v15_v1, %v14_v0  ;;  %v16_v4 = vmul.f32 %v14_v0, %v14_v0 }
   0x4   :  { %30 = vadd.xlane.f32.xlu0 %v18_v3  ;;  %v19_v5 = vadd.f32 %v17_v2, %v16_v4 }
   0x8   :  { %33 = vadd.xlane.f32.xlu0 %v19_v5 }
  0x91   :  { %v31_v6 = vpop.xlane.xlu0 %30 }
  0x95   :  { %v34_v7 = vpop.xlane.xlu0 %33 }
  0x96   :  { %v36_v8 = vsel %vm35_vm0, %v31_v6, %v34_v7 }
  0x97   :  { %38 = vst.msk [vmem:[%s63_s1] sm:$0xff] %vm37_vm1, %v36_v8 }

</bundles_post_ra>
